<compile_context>
chip_gen: v5e
topology: v5e:2x2
jax: 0.10.0
libtpu: 0.0.40
codegen_flags: <defaults>
</compile_context>

<pallas_src>
import jax
import jax.numpy as jnp
from jax.experimental import pallas as pl
from jax.experimental.pallas import tpu as pltpu


LANE = 128
# dtype itemsize -> minimum sublane rows for a legal TPU tile.
_MIN_SUBLANE = {4: 8, 2: 16, 1: 32}


def _gcu_kernel(x_ref, o_ref):
    x = x_ref[...]
    # cos has no EUP path — it lowers to a VPU polynomial. Keep the range
    # reduction + polynomial in f32 for accuracy on unbounded activations
    # (bf16 range reduction degrades for large |x|); cast once on store.
    # TODO(synk): optional native-bf16 compute on v6e/v7x when the activation
    # range is known-bounded, to halve VALU/vreg pressure.
    xf = x.astype(jnp.float32)
    o_ref[...] = (xf * jnp.cos(xf)).astype(o_ref.dtype)


def _chip_config():
    """(target_block_bytes, vmem_limit_bytes, min_grid_steps) per TPU generation."""
    try:
        kind = jax.devices()[0].device_kind.lower()
    except Exception:  # no devices / unusual backend: fall back to conservative
        kind = ""
    if "v7" in kind:
        # 2 TensorCores per chip -> want >=4 grid steps; 64 MiB physical VMEM.
        return 4 << 20, 48 << 20, 4
    if "v6" in kind:
        return 4 << 20, 48 << 20, 2
    # v5e / unknown: conservative (16 MiB default scoped VMEM).
    return 2 << 20, None, 1


def _pick_block_rows(rows: int, itemsize: int, target_block_bytes: int,
                     min_grid_steps: int) -> int:
    min_sub = _MIN_SUBLANE[itemsize]
    desired = (target_block_bytes // (LANE * itemsize)) // min_sub * min_sub
    desired = max(min_sub, desired)
    if min_grid_steps > 1:
        # Keep at least ~min_grid_steps grid steps so megacore sharding and
        # the DMA/compute pipeline both have work to overlap.
        cap = -(-rows // min_grid_steps)                      # cdiv
        cap = max(min_sub, -(-cap // min_sub) * min_sub)      # round up to tile
        desired = min(desired, cap)
    if rows <= desired:
        # Block covers the full row extent (always a legal block shape).
        return rows
    return desired


def _gcu_2d(x2d: jax.Array, block_rows: int, vmem_limit_bytes, alias_input: bool):
    rows, lane = x2d.shape
    grid = (pl.cdiv(rows, block_rows),)
    cp_kwargs = dict(dimension_semantics=("parallel",))
    if vmem_limit_bytes is not None:
        cp_kwargs["vmem_limit_bytes"] = vmem_limit_bytes
    return pl.pallas_call(
        _gcu_kernel,
        out_shape=jax.ShapeDtypeStruct((rows, lane), x2d.dtype),
        grid_spec=pl.GridSpec(
            grid=grid,
            in_specs=[pl.BlockSpec((block_rows, lane), lambda i: (i, 0))],
            out_specs=pl.BlockSpec((block_rows, lane), lambda i: (i, 0)),
        ),
        # Elementwise: output may reuse the input HBM buffer.  Off by default
        # so a non-donated caller input does not trigger a defensive copy;
        # turn on when x is dead after the call (e.g. donated inside a jit).
        input_output_aliases=({0: 0} if alias_input else {}),
        compiler_params=pltpu.CompilerParams(**cp_kwargs),
    )(x2d)


def growing_cosine_unit(x: jax.Array, *,
                        target_block_bytes: int | None = None,
                        alias_input: bool = False) -> jax.Array:
    """Elementwise x * cos(x) via a Pallas TPU kernel. Works for any shape."""
    orig_shape = x.shape
    itemsize = jnp.dtype(x.dtype).itemsize
    total = x.size

    if total == 0 or itemsize not in _MIN_SUBLANE:
        # TODO(synk): unsupported element packing (e.g. f64/complex) — fall
        # back to the fused XLA elementwise op rather than emit an illegal tile.
        return x * jnp.cos(x)

    chip_block_bytes, vmem_limit, min_grid_steps = _chip_config()
    if target_block_bytes is None:
        target_block_bytes = chip_block_bytes

    if total % LANE == 0:
        # Fast path: reshape is a free bitcast — no pad, no post-slice, so the
        # only HBM traffic is the kernel's one read + one write.
        rows = total // LANE
        block_rows = _pick_block_rows(rows, itemsize, target_block_bytes,
                                      min_grid_steps)
        out2d = _gcu_2d(x.reshape(rows, LANE), block_rows, vmem_limit, alias_input)
        return out2d.reshape(orig_shape)

    # Ragged path: Pallas kernel on the 128-aligned prefix, plain jnp on the
    # (<128-element) tail.  Avoids the old pad + slice, which cost two extra
    # full-tensor HBM passes on a memory-bound op.
    flat = jnp.ravel(x)
    aligned = (total // LANE) * LANE
    tail = flat[aligned:]
    tail_out = tail * jnp.cos(tail)
    if aligned == 0:
        return tail_out.reshape(orig_shape)
    rows = aligned // LANE
    block_rows = _pick_block_rows(rows, itemsize, target_block_bytes,
                                  min_grid_steps)
    prefix_out = _gcu_2d(flat[:aligned].reshape(rows, LANE), block_rows,
                         vmem_limit, alias_input)
    return jnp.concatenate([prefix_out.reshape(-1), tail_out]).reshape(orig_shape)


if __name__ == "__main__":
    key = jax.random.PRNGKey(0)

    # Primary check: NCHW activation tensor (fast path, numel % 128 == 0).
    x = jax.random.normal(key, (2, 4, 16, 16), dtype=jnp.float32)
    y = jax.block_until_ready(growing_cosine_unit(x))
    y_ref = x * jnp.cos(x)
    assert y.shape == x.shape and y.dtype == x.dtype
    assert jnp.allclose(y, y_ref, atol=1e-6, rtol=1e-6)

    # Ragged numel exercises the prefix+tail fallback path.
    x2 = jax.random.normal(jax.random.PRNGKey(1), (3, 5, 7), dtype=jnp.float32)
    y2 = jax.block_until_ready(growing_cosine_unit(x2))
    assert y2.shape == x2.shape and y2.dtype == x2.dtype
    assert jnp.allclose(y2, x2 * jnp.cos(x2), atol=1e-6, rtol=1e-6)

    # bf16 input (f32 internal compute, bf16 store).
    x3 = jax.random.normal(jax.random.PRNGKey(2), (4, 256), dtype=jnp.bfloat16)
    y3 = jax.block_until_ready(growing_cosine_unit(x3))
    ref3 = (x3.astype(jnp.float32) * jnp.cos(x3.astype(jnp.float32))).astype(jnp.bfloat16)
    assert y3.shape == x3.shape and y3.dtype == x3.dtype
    assert jnp.allclose(y3.astype(jnp.float32), ref3.astype(jnp.float32),
                        atol=2e-2, rtol=2e-2)

    # Aliased-output variant stays numerically identical.
    y4 = jax.block_until_ready(growing_cosine_unit(x, alias_input=True))
    assert jnp.allclose(y4, y_ref, atol=1e-6, rtol=1e-6)

    print("KERNEL_OK")
</pallas_src>

<mosaic_0001>
module attributes {stable_mosaic.version = 11 : i64} {
  func.func @_gcu_kernel(%arg0: i32, %arg1: memref<16x128xf32, #tpu.memory_space<vmem>>, %arg2: memref<16x128xf32, #tpu.memory_space<vmem>>) attributes {dimension_semantics = [#tpu.dimension_semantics<parallel>], iteration_bounds = array<i64: 1>, scalar_prefetch = 0 : i64, scratch_operands = 0 : i64, tpu.core_type = #tpu.core_type<tc>, window_params = [{transform_indices = @transform_0, window_bounds = array<i64: 16, 128>}, {transform_indices = @transform_1, window_bounds = array<i64: 16, 128>}]} {
    %c0 = arith.constant 0 : index
    %c0_0 = arith.constant 0 : index
    %0 = vector.load %arg1[%c0, %c0_0] : memref<16x128xf32, #tpu.memory_space<vmem>>, vector<16x128xf32>
    %1 = math.cos %0 : vector<16x128xf32>
    %2 = arith.mulf %0, %1 : vector<16x128xf32>
    %c0_1 = arith.constant 0 : index
    %c0_2 = arith.constant 0 : index
    %3 = vector.load %arg2[%c0_1, %c0_2] : memref<16x128xf32, #tpu.memory_space<vmem>>, vector<16x128xf32>
    tpu.vector_store %arg2[%c0_1, %c0_2], %2 {strides = array<i32>} : memref<16x128xf32, #tpu.memory_space<vmem>>, vector<16x128xf32>,
    return
  }
  func.func @transform_0(%arg0: i32) -> (i32, i32) {
    %c0_i32 = arith.constant 0 : i32
    %c0_i32_0 = arith.constant 0 : i32
    return %arg0, %c0_i32 : i32, i32
  }
  func.func @transform_1(%arg0: i32) -> (i32, i32) {
    %c0_i32 = arith.constant 0 : i32
    %c0_i32_0 = arith.constant 0 : i32
    return %arg0, %c0_i32 : i32, i32
  }
}

</mosaic_0001>

<bundles_post_ra>
// kernel: tpu_custom_call.1
= control target key start
LH: loop header
LB: loop body
LE: loop exit
PB: predicated region body
PF: predicated region fallthrough
CT: control target
= control target key end

     0   :  { %6 = vsyncpa [#allocation3], 0  ;;  %s643_s0 = inlined_call_operand.hbm [shape: f32[16,128], index: 0, kind: input, shape index: {}]   ;;  %s644_s1 = inlined_call_operand.hbm [shape: f32[16,128], index: 1, kind: output, shape index: {}]  }
   0x1   :  { %7 = vsyncpa [#allocation4], 0  ;;  %s12_s8 = sshll.u32 %s643_s0, 4  ;;  %s427_s9 = smov [#allocation2]   ;;  %s13_s8 = int_to_ptr.hbm [resolvable:$true] %s12_s8 }
   0x2   :  { %s14_s10 = sshll.u32 %s427_s9, 4  ;;  %s428_s11 = smov 128   ;;  %s15_s10 = int_to_ptr.vmem [resolvable:$true] %s14_s10 }
   0x3   :  { %s429_s12 = smov 8  }
   0x4   :  { %20 = dma.hbm_to_vmem [thread:$0]  %s13_s8, 256, %s15_s10, [#allocation3], %s428_s11, %s428_s11, %s429_s12  }
   0x5   :  { %423 = dma.done.wait [#allocation3], 256  }
   0x6   :  { %424 = vsyncadd [#allocation3], 4294967040  ;;  %v454_v0 = vld [vmem:[#allocation2] sm:$0xff]  ;;  %v456_v1 = vld [vmem:[#allocation2 + $0x8] sm:$0xff]  ;;  %v430_v23 = vmov 683565275  }
   0x7   :  { %v27_v2 = vand.u32 2147483647, %v454_v0  ;;  %v30_v3 = vand.u32 2139095040, %v454_v0  ;;  %v181_v4 = vand.u32 2147483647, %v456_v1  ;;  %v184_v5 = vand.u32 2139095040, %v456_v1 }
   0x8   :  { %v431_v25 = vmov 2475754826   ;;  %v432_v27 = vmov 2131351028   ;;  %v433_v29 = vmov 2102212464  }
   0x9   :  { %v31_v6 = vshrl.u32 %v30_v3, 23  ;;  %v34_v7 = vand.u32 8388607, %v27_v2  ;;  %v185_v8 = vshrl.u32 %v184_v5, 23  ;;  %v188_v12 = vand.u32 8388607, %v181_v4 }
   0xa   :  { %v434_v31 = vmov 920167782   ;;  %v435_v40 = vmov 1326507024   ;;  %s437_s0 = smov [#allocation5]   ;;  %s345_s16 = sshll.u32 %s644_s1, 4  ;;  %s346_s16 = int_to_ptr.hbm [resolvable:$true] %s345_s16 }
   0xb   :  { %v358_v9 = vadd.s32 4294967169, %v31_v6  ;;  %v35_v10 = vor.u32 8388608, %v34_v7  ;;  %v361_v11 = vadd.s32 4294967169, %v185_v8  ;;  %v189_v17 = vor.u32 8388608, %v188_v12  ;;  %s343_s13 = sshll.u32 %s437_s0, 4  ;;  %s344_s13 = int_to_ptr.vmem [resolvable:$true] %s343_s13 }
   0xd   :  { %v37_v13 = vadd.s32 1, %v358_v9  ;;  %v191_v14 = vadd.s32 1, %v361_v11  ;;  %v466_v16 = vshll.u32 %v35_v10, 8  ;;  %v476_v34 = vshll.u32 %v189_v17, 8 }
   0xf   :  { %vm38_vm0 = vcmp.gt.s32.totalorder %v37_v13, 0  ;;  %vm192_vm1 = vcmp.gt.s32.totalorder %v191_v14, 0  ;;  %v76_v33 = vand.u32 65535, %v466_v16  ;;  %v77_v38 = vshrl.u32 %v466_v16, 16 }
  0x10   :  { %v39_v15 = vsel %vm38_vm0, %v37_v13, 0  ;;  %v193_v19 = vsel %vm192_vm1, %v191_v14, 0 }
  0x11   :  { %v41_v18 = vand.u32 31, %v39_v15  ;;  %v468_v20 = vshrl.u32 %v39_v15, 5  ;;  %v470_v21 = vand.u32 31, %v193_v19  ;;  %v494_v51 = vshrl.u32 %v193_v19, 5 }
  0x13   :  { %v42_v22 = vsub.s32 32, %v41_v18  ;;  %v44_v24 = vshll.u32 %v430_v23, %v41_v18  ;;  %v47_v26 = vshll.u32 %v431_v25, %v41_v18  ;;  %v50_v28 = vshll.u32 %v432_v27, %v41_v18 }
  0x14   :  { %v53_v30 = vshll.u32 %v433_v29, %v41_v18  ;;  %v56_v32 = vshll.u32 %v434_v31, %v41_v18  ;;  %vm59_vm2 = vcmp.lt.s32.totalorder %v468_v20, 1  ;;  %vm62_vm3 = vcmp.lt.s32.totalorder %v468_v20, 4 }
  0x15   :  { %v45_v35 = vshrl.u32 %v431_v25, %v42_v22  ;;  %v48_v36 = vshrl.u32 %v432_v27, %v42_v22  ;;  %v51_v37 = vshrl.u32 %v433_v29, %v42_v22  ;;  %v54_v39 = vshrl.u32 %v434_v31, %v42_v22 }
  0x16   :  { %v57_v41 = vshrl.u32 %v435_v40, %v42_v22  ;;  %v485_v45 = vsub.s32 32, %v470_v21  ;;  %v43_v46 = vshrl.u32 %v430_v23, %v42_v22  ;;  %vm61_vm4 = vcmp.lt.s32.totalorder %v468_v20, 3 }
  0x17   :  { %v46_v42 = vor.u32 %v45_v35, %v44_v24  ;;  %v49_v43 = vor.u32 %v48_v36, %v47_v26  ;;  %v52_v44 = vor.u32 %v51_v37, %v50_v28  ;;  %v55_v47 = vor.u32 %v54_v39, %v53_v30 }
  0x18   :  { %v58_v48 = vor.u32 %v57_v41, %v56_v32  ;;  %vm60_vm5 = vcmp.lt.s32.totalorder %v468_v20, 2  ;;  %v198_v54 = vshll.u32 %v430_v23, %v470_v21  ;;  %v201_v55 = vshll.u32 %v431_v25, %v470_v21 }
  0x19   :  { %v67_v49 = vsel %vm59_vm2, %v46_v42, %v49_v43  ;;  %v71_v50 = vsel %vm59_vm2, %v49_v43, %v52_v44  ;;  %v68_v52 = vsel %vm62_vm3, %v55_v47, 920167782  ;;  %v64_v56 = vsel %vm62_vm3, %v52_v44, 2102212464 }
  0x1a   :  { %v72_v53 = vsel %vm62_vm3, %v58_v48, 1326507024  ;;  %v69_v57 = vsel %vm61_vm4, %v52_v44, %v68_v52  ;;  %v199_v59 = vshrl.u32 %v431_v25, %v485_v45  ;;  %v63_v60 = vsel %vm59_vm2, %v43_v46, %v46_v42 }
  0x1b   :  { %v73_v58 = vsel %vm61_vm4, %v55_v47, %v72_v53  ;;  %v70_v61 = vsel %vm60_vm5, %v67_v49, %v69_v57  ;;  %v202_v63 = vshrl.u32 %v432_v27, %v485_v45  ;;  %v65_v8 = vsel %vm61_vm4, %v49_v43, %v64_v56 }
  0x1c   :  { %v74_v62 = vsel %vm60_vm5, %v71_v50, %v73_v58  ;;  %v100_v6 = vand.u32 65535, %v70_v61  ;;  %v101_v7 = vshrl.u32 %v70_v61, 16  ;;  %v519_v9 = vor.u32 %v199_v59, %v198_v54 }
  0x1d   :  { %v78_v3 = vand.u32 65535, %v74_v62  ;;  %v79_v5 = vshrl.u32 %v74_v62, 16  ;;  %v521_v10 = vor.u32 %v202_v63, %v201_v55  ;;  %v204_v11 = vshll.u32 %v432_v27, %v470_v21 }
  0x1e   :  { %v205_v15 = vshrl.u32 %v433_v29, %v485_v45  ;;  %v102_v18 = vmul.u32 %v100_v6, %v76_v33  ;;  %v103_v19 = vmul.u32 %v101_v7, %v76_v33  ;;  %v104_v22 = vmul.u32 %v100_v6, %v77_v38 }
  0x1f   :  { %v80_v12 = vmul.u32 %v78_v3, %v76_v33  ;;  %v81_v13 = vmul.u32 %v79_v5, %v76_v33  ;;  %v82_v14 = vmul.u32 %v78_v3, %v77_v38  ;;  %v83_v17 = vmul.u32 %v79_v5, %v77_v38 }
  0x20   :  { %v105_v28 = vmul.u32 %v101_v7, %v77_v38  ;;  %v106_v32 = vshll.u32 %v103_v19, 16  ;;  %v107_v35 = vshrl.u32 %v103_v19, 16  ;;  %v108_v36 = vshll.u32 %v104_v22, 16 }
  0x21   :  { %v84_v24 = vshll.u32 %v81_v13, 16  ;;  %v85_v25 = vshrl.u32 %v81_v13, 16  ;;  %v86_v26 = vshll.u32 %v82_v14, 16  ;;  %v87_v30 = vshrl.u32 %v82_v14, 16 }
  0x22   :  { %v109_v37 = vshrl.u32 %v104_v22, 16  ;;  %v207_v39 = vshll.u32 %v433_v29, %v470_v21  ;;  %v436_v41 = vmov 0   ;;  %vm110_vm7 = vc.u32 %v102_v18, %v106_v32 }
  0x23   :  { %vm88_vm6 = vc.u32 %v80_v12, %v84_v24  ;;  %v90_v27 = vadd.s32 %v84_v24, %v80_v12  ;;  %v112_v33 = vadd.s32 %v106_v32, %v102_v18  ;;  %v208_v43 = vshrl.u32 %v434_v31, %v485_v45 }
  0x24   :  { %v89_v42 = vsel %vm88_vm6, 1, %v436_v41  ;;  %v111_v38 = vsel %vm110_vm7, 1, %v436_v41  ;;  %v210_v46 = vshll.u32 %v434_v31, %v470_v21  ;;  %v206_v29 = vor.u32 %v205_v15, %v204_v11 }
  0x25   :  { %v91_v44 = vadd.s32 %v89_v42, %v83_v17  ;;  %vm92_vm8 = vc.u32 %v90_v27, %v86_v26  ;;  %v113_v48 = vadd.s32 %v111_v38, %v105_v28  ;;  %vm114_vm9 = vc.u32 %v112_v33, %v108_v36 }
  0x26   :  { %v93_v47 = vsel %vm92_vm8, 1, %v436_v41  ;;  %v115_v50 = vsel %vm114_vm9, 1, %v436_v41  ;;  %v209_v52 = vor.u32 %v208_v43, %v207_v39  ;;  %v211_v53 = vshrl.u32 %v435_v40, %v485_v45 }
  0x27   :  { %v95_v49 = vadd.s32 %v93_v47, %v91_v44  ;;  %v538_v54 = vadd.s32 %v112_v33, %v108_v36  ;;  %v117_v55 = vadd.s32 %v115_v50, %v113_v48  ;;  %vm213_vm10 = vcmp.lt.s32.totalorder %v494_v51, 1 }
  0x28   :  { %vm215_vm11 = vcmp.lt.s32.totalorder %v494_v51, 3  ;;  %v212_v31 = vor.u32 %v211_v53, %v210_v46  ;;  %vm214_vm12 = vcmp.lt.s32.totalorder %v494_v51, 2  ;;  %vm216_vm13 = vcmp.lt.s32.totalorder %v494_v51, 4 }
  0x29   :  { %v96_v21 = vadd.s32 %v95_v49, %v85_v25  ;;  %v66_v56 = vsel %vm60_vm5, %v63_v60, %v65_v8  ;;  %v118_v57 = vadd.s32 %v117_v55, %v107_v35  ;;  %v221_v40 = vsel %vm213_vm10, %v519_v9, %v521_v10 }
  0x2a   :  { %v222_v58 = vsel %vm216_vm13, %v209_v52, 920167782  ;;  %v225_v62 = vsel %vm213_vm10, %v521_v10, %v206_v29  ;;  %v230_v20 = vand.u32 65535, %v476_v34  ;;  %v226_v3 = vsel %vm216_vm13, %v212_v31, 1326507024 }
  0x2b   :  { %v552_v59 = vadd.s32 %v96_v21, %v87_v30  ;;  %v223_v61 = vsel %vm215_vm11, %v206_v29, %v222_v58  ;;  %v119_v60 = vadd.s32 %v118_v57, %v109_v37  ;;  %v231_v5 = vshrl.u32 %v476_v34, 16 }
  0x2c   :  { %v224_v63 = vsel %vm214_vm12, %v221_v40, %v223_v61  ;;  %v120_v6 = vmul.u32 %v466_v16, %v66_v56  ;;  %v227_v7 = vsel %vm215_vm11, %v209_v52, %v226_v3  ;;  %v197_v18 = vshrl.u32 %v430_v23, %v485_v45 }
  0x2d   :  { %vm122_vm14 = vc.u32 %v552_v59, %v538_v54  ;;  %v254_v8 = vand.u32 65535, %v224_v63  ;;  %v123_v11 = vadd.s32 1, %v119_v60  ;;  %v228_v12 = vsel %vm214_vm12, %v225_v62, %v227_v7 }
  0x2e   :  { %v255_v13 = vshrl.u32 %v224_v63, 16  ;;  %v232_v14 = vand.u32 65535, %v228_v12  ;;  %v233_v15 = vshrl.u32 %v228_v12, 16  ;;  %v218_v35 = vsel %vm216_vm13, %v206_v29, 2102212464 }
  0x2f   :  { %v124_v17 = vsel %vm122_vm14, %v123_v11, %v119_v60  ;;  %v258_v16 = vmul.u32 %v254_v8, %v231_v5  ;;  %v256_v26 = vmul.u32 %v254_v8, %v230_v20  ;;  %v217_v37 = vsel %vm213_vm10, %v197_v18, %v519_v9 }
  0x30   :  { %v257_v19 = vmul.u32 %v255_v13, %v230_v20  ;;  %v125_v22 = vadd.s32 %v124_v17, %v120_v6  ;;  %v234_v24 = vmul.u32 %v232_v14, %v230_v20  ;;  %v235_v25 = vmul.u32 %v233_v15, %v230_v20 }
  0x31   :  { %v236_v28 = vmul.u32 %v232_v14, %v231_v5  ;;  %v237_v36 = vmul.u32 %v233_v15, %v231_v5  ;;  %v259_v23 = vmul.u32 %v255_v13, %v231_v5  ;;  %v262_v45 = vshll.u32 %v258_v16, 16 }
  0x32   :  { %v260_v30 = vshll.u32 %v257_v19, 16  ;;  %v126_v32 = vadd.s32 536870912, %v125_v22  ;;  %v238_v27 = vshll.u32 %v235_v25, 16  ;;  %v219_v43 = vsel %vm215_vm11, %v521_v10, %v218_v35 }
  0x33   :  { %v240_v39 = vshll.u32 %v236_v28, 16  ;;  %v239_v9 = vshrl.u32 %v235_v25, 16  ;;  %v261_v49 = vshrl.u32 %v257_v19, 16  ;;  %v241_v53 = vshrl.u32 %v236_v28, 16 }
  0x34   :  { %v579_v42 = vshrl.u32 %v126_v32, 30  ;;  %vm242_vm15 = vc.u32 %v234_v24, %v238_v27  ;;  %v244_v33 = vadd.s32 %v238_v27, %v234_v24  ;;  %vm264_vm0 = vc.u32 %v256_v26, %v260_v30 }
  0x35   :  { %v243_v44 = vsel %vm242_vm15, 1, %v436_v41  ;;  %v265_v38 = vsel %vm264_vm0, 1, %v436_v41  ;;  %v266_v46 = vadd.s32 %v260_v30, %v256_v26  ;;  %v263_v21 = vshrl.u32 %v258_v16, 16 }
  0x36   :  { %v128_v47 = vshll.u32 %v579_v42, 30  ;;  %v245_v48 = vadd.s32 %v243_v44, %v237_v36  ;;  %vm246_vm1 = vc.u32 %v244_v33, %v240_v39  ;;  %v267_v50 = vadd.s32 %v265_v38, %v259_v23 }
  0x37   :  { %v247_v29 = vsel %vm246_vm1, 1, %v436_v41  ;;  %vm268_vm2 = vc.u32 %v266_v46, %v262_v45  ;;  %v270_v40 = vadd.s32 %v266_v46, %v262_v45  ;;  %v220_v58 = vsel %vm214_vm12, %v217_v37, %v219_v43 }
  0x38   :  { %v129_v52 = vsub.s32 %v125_v22, %v128_v47  ;;  %v249_v55 = vadd.s32 %v247_v29, %v245_v48  ;;  %v269_v10 = vsel %vm268_vm2, 1, %v436_v41  ;;  %v274_v3 = vmul.u32 %v476_v34, %v220_v58 }
  0x39   :  { %v271_v31 = vadd.s32 %v269_v10, %v267_v50  ;;  %v121_v41 = vadd.s32 %v538_v54, %v552_v59  ;;  %vm29_vm7 = vcmp.lt.s32.totalorder %v454_v0, 0  ;;  %vm600_vm8 = vcmp.le.f32.partialorder %v27_v2, 0.7853982 }
  0x3a   :  { %vm130_vm3 = vcmp.lt.s32.totalorder %v129_v52, 0  ;;  %v131_v56 = vsub.s32 0, %v129_v52  ;;  %v250_v57 = vadd.s32 %v249_v55, %v239_v9  ;;  %v151_v37 = vsub.s32 4, %v579_v42 }
  0x3b   :  { %v272_v61 = vadd.s32 %v271_v31, %v261_v49  ;;  %vm183_vm11 = vcmp.lt.s32.totalorder %v456_v1, 0  ;;  %vm618_vm13 = vcmp.le.f32.partialorder %v181_v4, 0.7853982  ;;  %vm170_vm15 = vweird.f32 %v454_v0 }
  0x3c   :  { %v132_v62 = vsel %vm130_vm3, %v131_v56, %v129_v52  ;;  %v251_v20 = vadd.s32 %v250_v57, %v241_v53  ;;  %v152_v46 = vsel %vm29_vm7, %v151_v37, %v579_v42  ;;  %vm324_vm3 = vweird.f32 %v456_v1 }
  0x3d   :  { %v133_v60 = vclz %v132_v62  ;;  %v273_v63 = vadd.s32 %v272_v61, %v263_v21  ;;  %v154_v50 = vsel %vm600_vm8, 0, %v152_v46 }
  0x3e   :  { %vm276_vm4 = vc.u32 %v251_v20, %v270_v40  ;;  %v275_v45 = vadd.s32 %v270_v40, %v251_v20  ;;  %v171_v56 = vand.u32 3, %v154_v50 }
  0x3f   :  { %v359_v5 = vadd.s32 4294967294, %v133_v60  ;;  %v277_v6 = vadd.s32 1, %v273_v63 }
  0x40   :  { %vm176_vm10 = vcmp.eq.s32.totalorder %v171_v56, 2  ;;  %vm173_vm12 = vcmp.eq.s32.totalorder %v171_v56, 0  ;;  %vm172_vm14 = vcmp.lt.s32.totalorder %v171_v56, 2 }
  0x41   :  { %vm360_vm5 = vcmp.lt.s32.totalorder %v359_v5, 0  ;;  %v278_v7 = vsel %vm276_vm4, %v277_v6, %v273_v63 }
  0x42   :  { %v136_v8 = vsel %vm360_vm5, 0, %v359_v5  ;;  %v279_v11 = vadd.s32 %v278_v7, %v274_v3 }
  0x43   :  { %v137_v12 = vsub.s32 32, %v136_v8  ;;  %v138_v51 = vshll.u32 %v129_v52, %v136_v8  ;;  %v141_v13 = vsub.s32 4294967266, %v136_v8 }
  0x44   :  { %v280_v14 = vadd.s32 536870912, %v279_v11 }
  0x45   :  { %v139_v15 = vshrl.u32 %v121_v41, %v137_v12  ;;  %v142_v17 = vadd.s32 127, %v141_v13 }
  0x46   :  { %v594_v18 = vshrl.u32 %v280_v14, 30 }
  0x47   :  { %v140_v19 = vor.u32 %v139_v15, %v138_v51  ;;  %v143_v34 = vshll.u32 %v142_v17, 23 }
  0x48   :  { %v282_v16 = vshll.u32 %v594_v18, 30  ;;  %v305_v12 = vsub.s32 4, %v594_v18 }
  0x49   :  { %v144_v22 = vor.u32 4788187, %v143_v34  ;;  %v147_v24 = vcvt.s32.f32 %v140_v19 }
  0x4a   :  { %v283_v25 = vsub.s32 %v279_v11, %v282_v16  ;;  %v306_v34 = vsel %vm183_vm11, %v305_v12, %v594_v18 }
  0x4b   :  { %v145_v54 = vand.u32 2147483647, %v144_v22 }
  0x4c   :  { %vm284_vm6 = vcmp.lt.s32.totalorder %v283_v25, 0  ;;  %v285_v59 = vsub.s32 0, %v283_v25 }
  0x4d   :  { %v148_v26 = vmul.f32 %v147_v24, %v145_v54  ;;  %v308_v24 = vsel %vm618_vm13, 0, %v306_v34 }
  0x4e   :  { %v286_v28 = vsel %vm284_vm6, %v285_v59, %v283_v25 }
  0x4f   :  { %v149_v32 = vxor.u32 2147483648, %v148_v26  ;;  %v287_v35 = vclz %v286_v28  ;;  %v325_v28 = vand.u32 3, %v308_v24 }
  0x51   :  { %v150_v36 = vsel %vm29_vm7, %v149_v32, %v148_v26  ;;  %v362_v27 = vadd.s32 4294967294, %v287_v35  ;;  %vm330_vm0 = vcmp.eq.s32.totalorder %v325_v28, 2  ;;  %vm327_vm1 = vcmp.eq.s32.totalorder %v325_v28, 0 }
  0x52   :  { %v153_v39 = vsel %vm600_vm8, %v454_v0, %v150_v36  ;;  %vm326_vm2 = vcmp.lt.s32.totalorder %v325_v28, 2 }
  0x53   :  { %v155_v23 = vmul.f32 %v153_v39, %v153_v39  ;;  %vm363_vm9 = vcmp.lt.s32.totalorder %v362_v27, 0 }
  0x54   :  { %v290_v33 = vsel %vm363_vm9, 0, %v362_v27 }
  0x55   :  { %v156_v2 = vmul.f32 -0.001358992, %v155_v23  ;;  %v163_v43 = vmul.f32 -0.00019511016, %v155_v23  ;;  %v291_v44 = vsub.s32 32, %v290_v33  ;;  %v292_v38 = vshll.u32 %v283_v25, %v290_v33 }
  0x56   :  { %v295_v47 = vsub.s32 4294967266, %v290_v33 }
  0x57   :  { %v157_v9 = vadd.f32 0.041655596, %v156_v2  ;;  %v164_v48 = vadd.f32 0.008332121, %v163_v43  ;;  %v293_v29 = vshrl.u32 %v275_v45, %v291_v44 }
  0x58   :  { %v296_v49 = vadd.s32 127, %v295_v47 }
  0x59   :  { %v158_v52 = vmul.f32 %v157_v9, %v155_v23  ;;  %v165_v53 = vmul.f32 %v164_v48, %v155_v23  ;;  %v294_v55 = vor.u32 %v293_v29, %v292_v38 }
  0x5a   :  { %v297_v10 = vshll.u32 %v296_v49, 23 }
  0x5b   :  { %v159_v21 = vadd.f32 -0.4999988, %v158_v52  ;;  %v166_v31 = vadd.f32 -0.16666654, %v165_v53  ;;  %v301_v40 = vcvt.s32.f32 %v294_v55 }
  0x5c   :  { %v298_v57 = vor.u32 4788187, %v297_v10 }
  0x5d   :  { %v160_v58 = vmul.f32 %v159_v21, %v155_v23  ;;  %v167_v61 = vmul.f32 %v166_v31, %v155_v23 }
  0x5e   :  { %v299_v42 = vand.u32 2147483647, %v298_v57 }
  0x5f   :  { %v161_v62 = vadd.f32 1.0, %v160_v58  ;;  %v168_v20 = vadd.f32 1.0, %v167_v61 }
  0x60   :  { %v302_v60 = vmul.f32 %v301_v40, %v299_v42 }
  0x61   :  { %v169_v63 = vmul.f32 %v168_v20, %v153_v39  ;;  %v177_v3 = vxor.u32 2147483648, %v161_v62 }
  0x62   :  { %v303_v6 = vxor.u32 2147483648, %v302_v60 }
  0x63   :  { %v174_v41 = vxor.u32 2147483648, %v169_v63  ;;  %v178_v7 = vsel %vm176_vm10, %v177_v3, %v169_v63 }
  0x64   :  { %v304_v8 = vsel %vm183_vm11, %v303_v6, %v302_v60 }
  0x65   :  { %v175_v11 = vsel %vm173_vm12, %v161_v62, %v174_v41  ;;  %v307_v51 = vsel %vm618_vm13, %v456_v1, %v304_v8 }
  0x66   :  { %v179_v4 = vsel %vm172_vm14, %v175_v11, %v178_v7  ;;  %v309_v13 = vmul.f32 %v307_v51, %v307_v51 }
  0x67   :  { %v180_v14 = vsel %vm170_vm15, nan, %v179_v4 }
  0x68   :  { %v310_v15 = vmul.f32 -0.001358992, %v309_v13  ;;  %v317_v17 = vmul.f32 -0.00019511016, %v309_v13  ;;  %v335_v19 = vmul.f32 %v180_v14, %v454_v0 }
  0x6a   :  { %v311_v16 = vadd.f32 0.041655596, %v310_v15  ;;  %v318_v22 = vadd.f32 0.008332121, %v317_v17  ;;  %337 = vst [vmem:[#allocation5] sm:$0xff] %v335_v19 }
  0x6c   :  { %v312_v25 = vmul.f32 %v311_v16, %v309_v13  ;;  %v319_v54 = vmul.f32 %v318_v22, %v309_v13 }
  0x6e   :  { %v313_v59 = vadd.f32 -0.4999988, %v312_v25  ;;  %v320_v26 = vadd.f32 -0.16666654, %v319_v54 }
  0x70   :  { %v314_v30 = vmul.f32 %v313_v59, %v309_v13  ;;  %v321_v32 = vmul.f32 %v320_v26, %v309_v13 }
  0x72   :  { %v315_v35 = vadd.f32 1.0, %v314_v30  ;;  %v322_v36 = vadd.f32 1.0, %v321_v32 }
  0x74   :  { %v323_v0 = vmul.f32 %v322_v36, %v307_v51  ;;  %v331_v27 = vxor.u32 2147483648, %v315_v35 }
  0x76   :  { %v328_v18 = vxor.u32 2147483648, %v323_v0  ;;  %v332_v37 = vsel %vm330_vm0, %v331_v27, %v323_v0 }
  0x78   :  { %v329_v39 = vsel %vm327_vm1, %v315_v35, %v328_v18 }
  0x79   :  { %v333_v23 = vsel %vm326_vm2, %v329_v39, %v332_v37 }
  0x7a   :  { %v334_v45 = vsel %vm324_vm3, nan, %v333_v23 }
  0x7b   :  { %v336_v33 = vmul.f32 %v334_v45, %v456_v1 }
  0x7d   :  { %338 = vst [vmem:[#allocation5 + $0x8] sm:$0xff] %v336_v33 }
  0x7e   :  { %351 = dma.vmem_to_hbm [thread:$0]  %s344_s13, 256, %s346_s16, [#allocation4], %s428_s11, %s428_s11, %s429_s12  }
  0x7f   :  { %425 = dma.done.wait [#allocation4], 256  }
  0x80   :  { %426 = vsyncadd [#allocation4], 4294967040 }
  0x81   :  { %356 = vsyncpa [#allocation3], 1 }
  0x82   :  { %357 = vsyncpa [#allocation4], 1 }

</bundles_post_ra>
